<compile_context>
chip_gen: v7x
topology: tpu7x:2x2x1
jax: 0.10.0
libtpu: 0.0.40
codegen_flags: <defaults>
</compile_context>

<pallas_src>
import functools

import jax
import jax.numpy as jnp
from jax.experimental import pallas as pl
from jax.experimental.pallas import tpu as pltpu


def _kd_kernel(x_ref, t_ref, o_ref, *, inv_temp, n_rows, block_rows, need_mask):
    # Upcast in-kernel (bf16 inputs stay bf16 in HBM -> half the DMA traffic).
    x = x_ref[...].astype(jnp.float32) * inv_temp
    t = t_ref[...].astype(jnp.float32) * inv_temp

    # Student log-softmax pieces (row-wise, numerically stable).
    x_max = jnp.max(x, axis=-1, keepdims=True)
    x_sh = x - x_max
    x_lse = jnp.log(jnp.sum(jnp.exp(x_sh), axis=-1, keepdims=True))

    # Teacher softmax pieces (row-wise, numerically stable).
    t_max = jnp.max(t, axis=-1, keepdims=True)
    t_sh = t - t_max
    t_exp = jnp.exp(t_sh)
    t_sum = jnp.sum(t_exp, axis=-1, keepdims=True)

    # sum_j p_j * (log p_j - logp_j)
    #   = (sum_j e^{t_sh_j} (t_sh_j - x_sh_j)) / t_sum - log(t_sum) + x_lse
    # (e^{t_sh} underflow -> 0 * finite = 0, matching PyTorch's 0*log(0) := 0.)
    weighted = jnp.sum(t_exp * (t_sh - x_sh), axis=-1, keepdims=True)
    # approx=False: one exact per-row reciprocal is negligible and keeps tight
    # agreement with the reference (approx=True would also be fine perf-wise).
    kl_row = weighted * pl.reciprocal(t_sum, approx=False) - jnp.log(t_sum) + x_lse

    if need_mask:
        i = pl.program_id(0)
        row = jax.lax.broadcasted_iota(jnp.int32, kl_row.shape, 0) + i * block_rows
        kl_row = jnp.where(row < n_rows, kl_row, 0.0)

    o_ref[...] = kl_row


def _pick_block_rows(n_rows, n_cols, itemsize,
                     target_tile_bytes=2 * 1024 * 1024, max_rows=1024):
    """Largest multiple-of-8 row tile with ~target_tile_bytes per input tile."""
    rows = target_tile_bytes // max(n_cols * itemsize, 1)
    rows = int(max(8, (rows // 8) * 8))
    rows = min(rows, max_rows)
    if rows >= n_rows:
        return n_rows  # single block; block dim == full array dim is always legal
    return rows


def kd_loss(input_logits, target_logits, temperature=1.0, reduction="batchmean",
            block_rows=None, vmem_limit_bytes=48 * 1024 * 1024):
    assert input_logits.ndim == 2, f"wrong input shape {input_logits.shape}"
    assert input_logits.shape == target_logits.shape, (
        f"input {input_logits.shape} and target {target_logits.shape} mismatch")
    N, C = input_logits.shape
    itemsize = jnp.dtype(input_logits.dtype).itemsize

    # reduction -> scalar scale applied to the summed KL (then * T**2)
    if reduction == "batchmean":
        red_scale = 1.0 / N
    elif reduction == "sum":
        red_scale = 1.0
    elif reduction == "mean":
        red_scale = 1.0 / (N * C)
    else:
        # TODO(synk): 'none' reduction (per-element (N, C) output) not implemented.
        raise NotImplementedError(f"reduction={reduction}")

    scale = red_scale * float(temperature) ** 2
    inv_temp = 1.0 / float(temperature)

    if block_rows is None:
        block_rows = _pick_block_rows(N, C, itemsize)
    else:
        block_rows = min(int(block_rows), N)
    if block_rows < N:
        assert block_rows % 8 == 0, "block_rows must be a multiple of 8 when tiling N"

    num_blocks = pl.cdiv(N, block_rows)
    need_mask = (N % block_rows) != 0
    n_out_rows = num_blocks * block_rows  # padded rows (if any) are written as 0

    kernel = functools.partial(
        _kd_kernel, inv_temp=inv_temp, n_rows=N, block_rows=block_rows,
        need_mask=need_mask)

    cost = pl.CostEstimate(
        flops=int(10 * N * C),
        transcendentals=int(2 * N * C + 3 * N),
        bytes_accessed=int(2 * N * C * itemsize + n_out_rows * 4),
    )

    per_row = pl.pallas_call(
        kernel,
        out_shape=jax.ShapeDtypeStruct((n_out_rows, 1), jnp.float32),
        grid_spec=pltpu.PrefetchScalarGridSpec(
            num_scalar_prefetch=0,
            grid=(num_blocks,),
            in_specs=[
                pl.BlockSpec((block_rows, C), lambda i: (i, 0)),
                pl.BlockSpec((block_rows, C), lambda i: (i, 0)),
            ],
            out_specs=pl.BlockSpec((block_rows, 1), lambda i: (i, 0)),
        ),
        compiler_params=pltpu.CompilerParams(
            dimension_semantics=("parallel",),   # independent row tiles -> megacore OK
            vmem_limit_bytes=int(vmem_limit_bytes),
        ),
        cost_estimate=cost,
    )(input_logits, target_logits)

    # Tiny final reduction (N f32 values) + reduction/temperature scaling in XLA.
    return jnp.sum(per_row) * scale


def _kd_loss_ref(input_logits, target_logits, temperature=1.0, reduction="batchmean"):
    x = input_logits.astype(jnp.float32) / temperature
    t = target_logits.astype(jnp.float32) / temperature
    logp = jax.nn.log_softmax(x, axis=1)
    p = jax.nn.softmax(t, axis=1)
    logq = jax.nn.log_softmax(t, axis=1)
    kl = p * (logq - logp)
    total = jnp.sum(kl)
    if reduction == "batchmean":
        total = total / input_logits.shape[0]
    elif reduction == "mean":
        total = total / (input_logits.shape[0] * input_logits.shape[1])
    return total * float(temperature) ** 2


if __name__ == "__main__":
    key = jax.random.PRNGKey(0)
    k1, k2, k3, k4 = jax.random.split(key, 4)

    # Case 1: small shapes, single full-array block, batchmean reduction.
    N1, C1 = 16, 32
    temperature = 2.0
    student = jax.random.normal(k1, (N1, C1), dtype=jnp.float32)
    teacher = jax.random.normal(k2, (N1, C1), dtype=jnp.float32)
    loss1 = kd_loss(student, teacher, temperature=temperature, reduction="batchmean")
    loss1 = jax.block_until_ready(loss1)
    ref1 = _kd_loss_ref(student, teacher, temperature, "batchmean")
    assert jnp.allclose(loss1, ref1, rtol=1e-5, atol=1e-5), (loss1, ref1)

    # Case 2: N not a multiple of block_rows -> multi-block grid + masked tail.
    N2, C2 = 20, 128
    student2 = jax.random.normal(k3, (N2, C2), dtype=jnp.float32)
    teacher2 = jax.random.normal(k4, (N2, C2), dtype=jnp.float32)
    loss2 = kd_loss(student2, teacher2, temperature=1.0, reduction="sum",
                    block_rows=8)
    loss2 = jax.block_until_ready(loss2)
    ref2 = _kd_loss_ref(student2, teacher2, 1.0, "sum")
    assert jnp.allclose(loss2, ref2, rtol=1e-4, atol=1e-4), (loss2, ref2)

    print("KERNEL_OK")
</pallas_src>

<mosaic_0001>
module attributes {stable_mosaic.version = 11 : i64} {
  func.func @_kd_kernel(%arg0: i32, %arg1: memref<16x32xf32, #tpu.memory_space<vmem>>, %arg2: memref<16x32xf32, #tpu.memory_space<vmem>>, %arg3: memref<16x1xf32, #tpu.memory_space<vmem>>) attributes {dimension_semantics = [#tpu.dimension_semantics<parallel>], iteration_bounds = array<i64: 1>, scalar_prefetch = 0 : i64, scratch_operands = 0 : i64, tpu.core_type = #tpu.core_type<tc>, window_params = [{transform_indices = @transform_0, window_bounds = array<i64: 16, 32>}, {transform_indices = @transform_1, window_bounds = array<i64: 16, 32>}, {transform_indices = @transform_2, window_bounds = array<i64: 16, 1>}]} {
    %c0 = arith.constant 0 : index
    %c0_0 = arith.constant 0 : index
    %0 = vector.load %arg1[%c0, %c0_0] : memref<16x32xf32, #tpu.memory_space<vmem>>, vector<16x32xf32>
    %cst = arith.constant 5.000000e-01 : f32
    %1 = vector.broadcast %cst : f32 to vector<16x32xf32>
    %2 = arith.mulf %0, %1 : vector<16x32xf32>
    %c0_1 = arith.constant 0 : index
    %c0_2 = arith.constant 0 : index
    %3 = vector.load %arg2[%c0_1, %c0_2] : memref<16x32xf32, #tpu.memory_space<vmem>>, vector<16x32xf32>
    %cst_3 = arith.constant 5.000000e-01 : f32
    %4 = vector.broadcast %cst_3 : f32 to vector<16x32xf32>
    %5 = arith.mulf %3, %4 : vector<16x32xf32>
    %cst_4 = arith.constant dense<0xFF800000> : vector<16xf32>
    %6 = vector.multi_reduction <maximumf>, %2, %cst_4 [1] : vector<16x32xf32> to vector<16xf32>
    %7 = vector.shape_cast %6 : vector<16xf32> to vector<16x1xf32>
    %8 = vector.broadcast %7 : vector<16x1xf32> to vector<16x32xf32>
    %9 = arith.subf %2, %8 : vector<16x32xf32>
    %10 = math.exp %9 : vector<16x32xf32>
    %cst_5 = arith.constant dense<0.000000e+00> : vector<16xf32>
    %11 = vector.multi_reduction <add>, %10, %cst_5 [1] : vector<16x32xf32> to vector<16xf32>
    %12 = vector.shape_cast %11 : vector<16xf32> to vector<16x1xf32>
    %13 = math.log %12 : vector<16x1xf32>
    %cst_6 = arith.constant dense<0xFF800000> : vector<16xf32>
    %14 = vector.multi_reduction <maximumf>, %5, %cst_6 [1] : vector<16x32xf32> to vector<16xf32>
    %15 = vector.shape_cast %14 : vector<16xf32> to vector<16x1xf32>
    %16 = vector.broadcast %15 : vector<16x1xf32> to vector<16x32xf32>
    %17 = arith.subf %5, %16 : vector<16x32xf32>
    %18 = math.exp %17 : vector<16x32xf32>
    %cst_7 = arith.constant dense<0.000000e+00> : vector<16xf32>
    %19 = vector.multi_reduction <add>, %18, %cst_7 [1] : vector<16x32xf32> to vector<16xf32>
    %20 = vector.shape_cast %19 : vector<16xf32> to vector<16x1xf32>
    %21 = arith.subf %17, %9 : vector<16x32xf32>
    %22 = arith.mulf %18, %21 : vector<16x32xf32>
    %cst_8 = arith.constant dense<0.000000e+00> : vector<16xf32>
    %23 = vector.multi_reduction <add>, %22, %cst_8 [1] : vector<16x32xf32> to vector<16xf32>
    %24 = vector.shape_cast %23 : vector<16xf32> to vector<16x1xf32>
    %25 = tpu.reciprocal %20 : vector<16x1xf32> -> vector<16x1xf32>
    %26 = arith.mulf %24, %25 : vector<16x1xf32>
    %27 = math.log %20 : vector<16x1xf32>
    %28 = arith.subf %26, %27 : vector<16x1xf32>
    %29 = arith.addf %28, %13 : vector<16x1xf32>
    %c0_9 = arith.constant 0 : index
    %c0_10 = arith.constant 0 : index
    %30 = vector.load %arg3[%c0_9, %c0_10] : memref<16x1xf32, #tpu.memory_space<vmem>>, vector<16x1xf32>
    tpu.vector_store %arg3[%c0_9, %c0_10], %29 {strides = array<i32>} : memref<16x1xf32, #tpu.memory_space<vmem>>, vector<16x1xf32>,
    return
  }
  func.func @transform_0(%arg0: i32) -> (i32, i32) {
    %c0_i32 = arith.constant 0 : i32
    %c0_i32_0 = arith.constant 0 : i32
    return %arg0, %c0_i32 : i32, i32
  }
  func.func @transform_1(%arg0: i32) -> (i32, i32) {
    %c0_i32 = arith.constant 0 : i32
    %c0_i32_0 = arith.constant 0 : i32
    return %arg0, %c0_i32 : i32, i32
  }
  func.func @transform_2(%arg0: i32) -> (i32, i32) {
    %c0_i32 = arith.constant 0 : i32
    %c0_i32_0 = arith.constant 0 : i32
    return %arg0, %c0_i32 : i32, i32
  }
}

</mosaic_0001>

<bundles_post_ra>
// kernel: tpu_custom_call.1
= control target key start
LH: loop header
LB: loop body
LE: loop exit
PB: predicated region body
PF: predicated region fallthrough
CT: control target
= control target key end

     0   :  { %7 = vsyncpa [#allocation3], 0  ;;  %s250_s0 = inlined_call_operand.hbm [shape: f32[16,32], index: 0, kind: input, shape index: {}]   ;;  %s251_s1 = inlined_call_operand.hbm [shape: f32[16,32], index: 1, kind: input, shape index: {}]   ;;  %s252_s2 = inlined_call_operand.vmem [shape: f32[16,1], index: 2, kind: output, shape index: {}]  }
   0x1   :  { %8 = vsyncpa [#allocation5], 0  ;;  %s191_s9 = smov [#allocation2]   ;;  %s143_s13 = scalar_lea.hbm %s250_s0, 256 }
   0x2   :  { %s14_s10 = sshll.u32 %s191_s9, 4  ;;  %p144_p0 = scmp.ne.s32.totalorder %s250_s0, %s143_s13  ;;  %s15_s10 = int_to_ptr.vmem [resolvable:$true] %s14_s10 }
   0x3   :  { %p147_p1 = scmp.lt.u32.totalorder %s143_s13, %s250_s0 }
   0x5   :  { %p149_p2 = pnand %p147_p1, %p144_p0 }
   0x7   :  { %152 = shalt.err (!%p149_p2)
}
   0x8   :  { %s153_s18 = scalar_lea.vmem %s15_s10, 256  ;;  %p158_p4 = scmp.lt.s32.totalorder %s15_s10, %s15_s10 }
   0x9   :  { %p154_p3 = scmp.ne.s32.totalorder %s15_s10, %s153_s18  ;;  %p159_p5 = scmp.lt.s32.totalorder %s153_s18, %s153_s18 }
   0xb   :  { %p160_p6 = por %p159_p5, %p158_p4 }
   0xd   :  { %p161_p7 = pnand %p160_p6, %p154_p3 }
   0xf   :  { %164 = shalt.err (!%p161_p7)
}
  0x10   :  { %s192_s19 = smov 128   ;;  %s193_s20 = smov 8  }
  0x11   :  { %20 = dma.hbm_to_vmem [thread:$0]  %s250_s0, 256, %s15_s10, [#allocation3], %s192_s19, %s192_s19, %s193_s20  }
  0x12   :  { %s194_s23 = smov [#allocation4]   ;;  %s165_s27 = scalar_lea.hbm %s251_s1, 256 }
  0x13   :  { %s26_s24 = sshll.u32 %s194_s23, 4  ;;  %p166_p8 = scmp.ne.s32.totalorder %s251_s1, %s165_s27  ;;  %s27_s24 = int_to_ptr.vmem [resolvable:$true] %s26_s24 }
  0x14   :  { %p169_p9 = scmp.lt.u32.totalorder %s165_s27, %s251_s1 }
  0x16   :  { %p171_p10 = pnand %p169_p9, %p166_p8 }
  0x18   :  { %174 = shalt.err (!%p171_p10)
}
  0x19   :  { %s175_s4 = scalar_lea.vmem %s27_s24, 256  ;;  %p180_p12 = scmp.lt.s32.totalorder %s27_s24, %s27_s24 }
  0x1a   :  { %p176_p11 = scmp.ne.s32.totalorder %s27_s24, %s175_s4  ;;  %p181_p13 = scmp.lt.s32.totalorder %s175_s4, %s175_s4 }
  0x1c   :  { %p182_p0 = por %p181_p13, %p180_p12 }
  0x1e   :  { %p183_p1 = pnand %p182_p0, %p176_p11 }
  0x20   :  { %186 = shalt.err (!%p183_p1)
}
  0x21   :  { %32 = dma.hbm_to_vmem [thread:$0]  %s251_s1, 256, %s27_s24, [#allocation5], %s192_s19, %s192_s19, %s193_s20  }
  0x22   :  { %187 = dma.done.wait [#allocation3], 256  }
  0x23   :  { %188 = vsyncadd [#allocation3], 4294967040 }
  0x24   :  { %189 = dma.done.wait [#allocation5], 256  }
  0x25   :  { %190 = vsyncadd [#allocation5], 4294967040  ;;  %v43_v0 = vld [vmem:[#allocation4] sm:$0xff]  ;;  %vm47_vm0 = vcmask 261120   ;;  %v39_v1 = vld [vmem:[#allocation2] sm:$0xff]  ;;  %vm110_vm1 = vcmask 7168  }
  0x26   :  { %v44_v2 = vld [vmem:[#allocation4 + $0x8] sm:$0xff]  ;;  %v45_v3 = vmul.f32 0.5, %v43_v0  ;;  %v41_v4 = vmul.f32 0.5, %v39_v1  ;;  %v40_v6 = vld [vmem:[#allocation2 + $0x8] sm:$0xff] }
  0x27   :  { %v46_v5 = vmul.f32 0.5, %v44_v2  ;;  %v42_v7 = vmul.f32 0.5, %v40_v6 }
  0x28   :  { %v70_v8 = vsel %vm47_vm0, %v45_v3, -inf  ;;  %v48_v9 = vsel %vm47_vm0, %v41_v4, -inf }
  0x29   :  { %71 = vmax.xlane.f32.xlu0 %v70_v8  ;;  %49 = vmax.xlane.f32.xlu1 %v48_v9  ;;  %v73_v10 = vsel %vm47_vm0, %v46_v5, -inf  ;;  %v51_v11 = vsel %vm47_vm0, %v42_v7, -inf }
  0x2d   :  { %74 = vmax.xlane.f32.xlu0 %v73_v10  ;;  %52 = vmax.xlane.f32.xlu1 %v51_v11 }
  0xb6   :  { %v72_v12 = vpop.xlane.xlu0 %71  ;;  %v50_v13 = vpop.xlane.xlu1 %49 }
  0xb7   :  { %v76_v14 = vsub.f32 %v45_v3, %v72_v12  ;;  %v54_v15 = vsub.f32 %v41_v4, %v50_v13 }
  0xb9   :  { %v78_v16 = vmul.f32 1.442695, %v76_v14  ;;  %v56_v17 = vmul.f32 1.442695, %v54_v15  ;;  %v88_v27 = vsub.f32 %v76_v14, %v54_v15 }
  0xba   :  { %v75_v18 = vpop.xlane.xlu0 %74  ;;  %v53_v19 = vpop.xlane.xlu1 %52 }
  0xbb   :  { %123 = vpow2.f32 %v78_v16  ;;  %v77_v20 = vsub.f32 %v46_v5, %v75_v18  ;;  %v55_v21 = vsub.f32 %v42_v7, %v53_v19 }
  0xbc   :  { %125 = vpow2.f32 %v56_v17 }
  0xbd   :  { %v80_v22 = vmul.f32 1.442695, %v77_v20  ;;  %v58_v23 = vmul.f32 1.442695, %v55_v21  ;;  %v89_v33 = vsub.f32 %v77_v20, %v55_v21 }
  0xbf   :  { %127 = vpow2.f32 %v80_v22 }
  0xc0   :  { %129 = vpow2.f32 %v58_v23 }
  0xc5   :  { %v124_v24 = vpop.eup %123 }
  0xc6   :  { %v126_v25 = vpop.eup %125  ;;  %v82_v26 = vsel %vm47_vm0, %v124_v24, 0.0  ;;  %v90_v32 = vmul.f32 %v124_v24, %v88_v27 }
  0xc7   :  { %83 = vadd.xlane.f32.xlu0 %v82_v26  ;;  %v60_v28 = vsel %vm47_vm0, %v126_v25, 0.0 }
  0xc8   :  { %v92_v35 = vsel %vm47_vm0, %v90_v32, 0.0 }
  0xc9   :  { %v128_v29 = vpop.eup %127 }
  0xca   :  { %v130_v30 = vpop.eup %129  ;;  %v85_v31 = vsel %vm47_vm0, %v128_v29, 0.0  ;;  %v91_v36 = vmul.f32 %v128_v29, %v89_v33 }
  0xcb   :  { %86 = vadd.xlane.f32.xlu1 %v85_v31  ;;  %61 = vadd.xlane.f32.xlu0 %v60_v28  ;;  %v63_v34 = vsel %vm47_vm0, %v130_v30, 0.0 }
  0xcc   :  { %v95_v37 = vsel %vm47_vm0, %v91_v36, 0.0 }
  0xcf   :  { %93 = vadd.xlane.f32.xlu0 %v92_v35  ;;  %64 = vadd.xlane.f32.xlu1 %v63_v34 }
  0xd3   :  { %96 = vadd.xlane.f32.xlu1 %v95_v37 }
 0x154   :  { %v84_v38 = vpop.xlane.xlu0 %83 }
 0x155   :  { %131 = vrcp.f32 %v84_v38 }
 0x156   :  { %133 = vlog2.f32 %v84_v38 }
 0x158   :  { %v62_v39 = vpop.xlane.xlu0 %61  ;;  %v87_v40 = vpop.xlane.xlu1 %86 }
 0x159   :  { %135 = vlog2.f32 %v62_v39 }
 0x15a   :  { %137 = vrcp.f32 %v87_v40 }
 0x15b   :  { %139 = vlog2.f32 %v87_v40 }
 0x15c   :  { %v65_v41 = vpop.xlane.xlu1 %64  ;;  %v94_v43 = vpop.xlane.xlu0 %93 }
 0x15d   :  { %141 = vlog2.f32 %v65_v41 }
 0x15f   :  { %v132_v42 = vpop.eup %131 }
 0x160   :  { %v134_v44 = vpop.eup %133  ;;  %v100_v45 = vmul.f32 %v132_v42, %v94_v43  ;;  %v97_v51 = vpop.xlane.xlu1 %96 }
 0x161   :  { %v103_v46 = vmul.f32 0.6931472, %v134_v44 }
 0x163   :  { %v136_v47 = vpop.eup %135  ;;  %v106_v50 = vsub.f32 %v100_v45, %v103_v46 }
 0x164   :  { %v138_v48 = vpop.eup %137  ;;  %v67_v49 = vmul.f32 0.6931472, %v136_v47 }
 0x165   :  { %v140_v52 = vpop.eup %139  ;;  %v101_v53 = vmul.f32 %v138_v48, %v97_v51 }
 0x166   :  { %v108_v54 = vadd.f32 %v106_v50, %v67_v49  ;;  %v105_v55 = vmul.f32 0.6931472, %v140_v52 }
 0x167   :  { %v142_v56 = vpop.eup %141 }
 0x168   :  { %111 = vst.msk [vmem:[%s252_s2] sm:$0xff] %vm110_vm1, %v108_v54  ;;  %v69_v57 = vmul.f32 0.6931472, %v142_v56  ;;  %v107_v58 = vsub.f32 %v101_v53, %v105_v55 }
 0x16a   :  { %v109_v59 = vadd.f32 %v107_v58, %v69_v57 }
 0x16c   :  { %112 = vst.msk [vmem:[%s252_s2 + $0x8] sm:$0xff] %vm110_vm1, %v109_v59 }
 0x16d   :  { %117 = vsyncpa [#allocation3], 1 }
 0x16e   :  { %118 = vsyncpa [#allocation5], 1 }

</bundles_post_ra>
